<compile_context>
chip_gen: v7x
topology: tpu7x:2x2x1
jax: 0.10.0
libtpu: 0.0.40
codegen_flags: <defaults>
</compile_context>

<pallas_src>
import jax
import jax.numpy as jnp
from jax.experimental import pallas as pl
from jax.experimental.pallas import tpu as pltpu

_LANE = 128


def _outconv_kernel(x_ref, w_ref, b_ref, o_ref):
    """x: (bn, Cin, THW)  w: (Cout, Cin)  b: (Cout, 1)  o: (bn, Cout, THW)."""
    w = w_ref[...]
    bias = b_ref[...]                     # (Cout, 1) broadcasts over lanes
    for i in range(x_ref.shape[0]):       # bn is static and small (usually 1)
        y = jnp.dot(w, x_ref[i], preferred_element_type=jnp.float32)
        o_ref[i] = (y + bias).astype(o_ref.dtype)


def _vmem_capacity_bytes():
    """Physical VMEM per core (64 MiB on v7x, 128 MiB on v5e/v6e)."""
    try:
        return int(pltpu.get_tpu_info().vmem_capacity_bytes)
    except Exception:
        return 64 * 1024 * 1024            # conservative fallback (v7x)


def _choose_tiling(N, Cin, Cout, HW, itemsize, vmem_cap):
    """Pick (batch block, HW tile) from a traffic target and a VMEM budget."""
    cdiv = lambda a, b: -(-a // b)
    hw_blocks = cdiv(HW, _LANE)
    per_lane = (Cin + Cout) * itemsize     # x-read + out-write bytes per lane col

    block_budget = min(24 << 20, vmem_cap // 2)   # double-buffered x+out blocks
    target_bytes = 4 << 20                        # ~4 MB of HBM traffic per step

    thw = min(target_bytes // per_lane, block_budget // (2 * per_lane))
    thw = max(_LANE, (thw // _LANE) * _LANE)
    thw = min(thw, hw_blocks * _LANE)
    if thw >= HW:
        thw = HW            # single tile covers the image: full-extent block

    # Small images: fold several batch images per step to amortize the fixed
    # per-grid-step pipeline overhead and produce HBM-sized DMAs.
    bn = 1
    if thw >= HW and N > 1:
        step_bytes = per_lane * max(thw, 1)
        bn = min(N, max(1, target_bytes // step_bytes))
        bn = min(bn, max(1, block_budget // (2 * step_bytes)))

    # Keep >=2 grid steps when possible so v7x megacore has work to shard.
    if cdiv(N, bn) * cdiv(HW, thw) < 2:
        if N >= 2:
            bn = cdiv(N, 2)
        elif hw_blocks >= 2:
            thw = cdiv(hw_blocks, 2) * _LANE
    return bn, thw


@jax.jit
def out_conv(x, w, b):
    """x: (N, Cin, H, W) NCHW.  w: (Cout, Cin, 1, 1) OIHW.  b: (Cout,).

    Returns (N, Cout, H, W); identical semantics to nn.Conv2d(Cin, Cout, 1).
    """
    N, Cin, H, W = x.shape
    Cout = w.shape[0]
    HW = H * W
    itemsize = jnp.dtype(x.dtype).itemsize

    # Free, layout-preserving reshapes (merge/squeeze of trailing dims only).
    x2 = x.reshape(N, Cin, HW)
    w2 = w.reshape(Cout, Cin)
    b2 = b.reshape(Cout, 1)

    vmem_cap = _vmem_capacity_bytes()
    bn, thw = _choose_tiling(N, Cin, Cout, HW, itemsize, vmem_cap)
    grid = (pl.cdiv(N, bn), pl.cdiv(HW, thw))

    # Raise the scoped-VMEM limit above the 16/32 MiB defaults, sized to the
    # actual double-buffered working set and capped well under v7x's 64 MiB.
    blocks_bytes = (2 * bn * (Cin + Cout) * thw * itemsize
                    + 2 * (Cout * Cin + Cout) * itemsize)
    vmem_limit = int(min(vmem_cap, max(blocks_bytes + (8 << 20), 32 << 20)))

    out = pl.pallas_call(
        _outconv_kernel,
        out_shape=jax.ShapeDtypeStruct((N, Cout, HW), x.dtype),
        grid=grid,
        in_specs=[
            pl.BlockSpec((bn, Cin, thw), lambda n, t: (n, 0, t)),   # activations
            pl.BlockSpec((Cout, Cin), lambda n, t: (0, 0)),         # weights
            pl.BlockSpec((Cout, 1), lambda n, t: (0, 0)),           # bias
        ],
        out_specs=pl.BlockSpec((bn, Cout, thw), lambda n, t: (n, 0, t)),
        compiler_params=pltpu.CompilerParams(
            dimension_semantics=("parallel", "parallel"),
            vmem_limit_bytes=vmem_limit,
        ),
    )(x2, w2, b2)

    return out.reshape(N, Cout, H, W)


if __name__ == "__main__":
    key = jax.random.PRNGKey(0)
    kx, kw, kb = jax.random.split(key, 3)

    # Small shapes consistent with OutConv: NCHW input, 1x1 conv weights.
    N, Cin, H, W = 2, 4, 16, 16
    Cout = 8

    x = jax.random.normal(kx, (N, Cin, H, W), jnp.float32)
    w = jax.random.normal(kw, (Cout, Cin, 1, 1), jnp.float32) * 0.1
    b = jax.random.normal(kb, (Cout,), jnp.float32) * 0.1

    out = jax.block_until_ready(out_conv(x, w, b))

    # Pure-JAX reference for the 1x1 conv with bias.
    ref = jnp.einsum("nchw,oc->nohw", x, w.reshape(Cout, Cin)) \
        + b[None, :, None, None]
    ref = jax.block_until_ready(ref)

    assert out.shape == (N, Cout, H, W)
    assert jnp.allclose(out, ref, atol=1e-5, rtol=1e-5), "mismatch vs JAX reference"

    print("KERNEL_OK")
</pallas_src>

<mosaic_0001>
module attributes {stable_mosaic.version = 11 : i64} {
  func.func @_outconv_kernel(%arg0: i32, %arg1: i32, %arg2: memref<1x4x256xf32, #tpu.memory_space<vmem>>, %arg3: memref<8x4xf32, #tpu.memory_space<vmem>>, %arg4: memref<8x1xf32, #tpu.memory_space<vmem>>, %arg5: memref<1x8x256xf32, #tpu.memory_space<vmem>>) attributes {dimension_semantics = [#tpu.dimension_semantics<parallel>, #tpu.dimension_semantics<parallel>], iteration_bounds = array<i64: 2, 1>, scalar_prefetch = 0 : i64, scratch_operands = 0 : i64, tpu.core_type = #tpu.core_type<tc>, window_params = [{transform_indices = @transform_0, window_bounds = array<i64: 1, 4, 256>}, {pipeline_mode = #tpu.pipeline_mode<synchronous>, transform_indices = @transform_1, window_bounds = array<i64: 8, 4>}, {pipeline_mode = #tpu.pipeline_mode<synchronous>, transform_indices = @transform_2, window_bounds = array<i64: 8, 1>}, {transform_indices = @transform_3, window_bounds = array<i64: 1, 8, 256>}]} {
    %c0 = arith.constant 0 : index
    %c0_0 = arith.constant 0 : index
    %0 = vector.load %arg3[%c0, %c0_0] : memref<8x4xf32, #tpu.memory_space<vmem>>, vector<8x4xf32>
    %c0_1 = arith.constant 0 : index
    %c0_2 = arith.constant 0 : index
    %1 = vector.load %arg4[%c0_1, %c0_2] : memref<8x1xf32, #tpu.memory_space<vmem>>, vector<8x1xf32>
    %c0_3 = arith.constant 0 : index
    %c0_4 = arith.constant 0 : index
    %c0_5 = arith.constant 0 : index
    %2 = vector.load %arg2[%c0_3, %c0_4, %c0_5] : memref<1x4x256xf32, #tpu.memory_space<vmem>>, vector<1x4x256xf32>
    %3 = vector.shape_cast %2 : vector<1x4x256xf32> to vector<4x256xf32>
    %cst = arith.constant dense<0.000000e+00> : vector<8x256xf32>
    %4 = tpu.matmul %0, %3, %cst {dimension_numbers = #tpu.dot_dimension_numbers<[1], [0], [0], [1], [0, 0, 1, 1], [], []>} : vector<8x4xf32>, vector<4x256xf32>, vector<8x256xf32> -> vector<8x256xf32>
    %5 = vector.broadcast %1 : vector<8x1xf32> to vector<8x256xf32>
    %6 = arith.addf %4, %5 : vector<8x256xf32>
    %c0_6 = arith.constant 0 : index
    %c0_7 = arith.constant 0 : index
    %c0_8 = arith.constant 0 : index
    %7 = vector.load %arg5[%c0_6, %c0_7, %c0_8] : memref<1x8x256xf32, #tpu.memory_space<vmem>>, vector<1x8x256xf32>
    %8 = vector.shape_cast %7 : vector<1x8x256xf32> to vector<8x256xf32>
    %9 = vector.shape_cast %6 : vector<8x256xf32> to vector<1x8x256xf32>
    tpu.vector_store %arg5[%c0_6, %c0_7, %c0_8], %9 {strides = array<i32>} : memref<1x8x256xf32, #tpu.memory_space<vmem>>, vector<1x8x256xf32>,
    return
  }
  func.func @transform_0(%arg0: i32, %arg1: i32) -> (i32, i32, i32) {
    %c0_i32 = arith.constant 0 : i32
    %c0_i32_0 = arith.constant 0 : i32
    return %arg0, %c0_i32, %arg1 : i32, i32, i32
  }
  func.func @transform_1(%arg0: i32, %arg1: i32) -> (i32, i32) {
    %c0_i32 = arith.constant 0 : i32
    %c0_i32_0 = arith.constant 0 : i32
    %c0_i32_1 = arith.constant 0 : i32
    return %c0_i32, %c0_i32_0 : i32, i32
  }
  func.func @transform_2(%arg0: i32, %arg1: i32) -> (i32, i32) {
    %c0_i32 = arith.constant 0 : i32
    %c0_i32_0 = arith.constant 0 : i32
    %c0_i32_1 = arith.constant 0 : i32
    return %c0_i32, %c0_i32_0 : i32, i32
  }
  func.func @transform_3(%arg0: i32, %arg1: i32) -> (i32, i32, i32) {
    %c0_i32 = arith.constant 0 : i32
    %c0_i32_0 = arith.constant 0 : i32
    return %arg0, %c0_i32, %arg1 : i32, i32, i32
  }
}

</mosaic_0001>

<bundles_post_ra>
// kernel: out_conv.1
= control target key start
LH: loop header
LB: loop body
LE: loop exit
PB: predicated region body
PF: predicated region fallthrough
CT: control target
= control target key end

     0   :  { %s479_s12 = smov 0   ;;  %s481_s13 = smov 0   ;;  %s518_s0 = inlined_call_operand.vmem [shape: f32[2,4,256], index: 0, kind: input, shape index: {}]   ;;  %s519_s1 = inlined_call_operand.vmem [shape: f32[8,4], index: 1, kind: input, shape index: {}]   ;;  %s520_s2 = inlined_call_operand.vmem [shape: f32[8,1], index: 2, kind: input, shape index: {}]   ;;  %s521_s3 = inlined_call_operand.vmem [shape: f32[2,8,256], index: 3, kind: output, shape index: {}]  }
   0x1   :  { %s483_s14 = smov 0  }
   0x2 LB: > { %s25_s15 = sadd.s32 1, %s451_s13  ;;  %p393_p0 = scmp.ge.s32.totalorder %s455_s14, 1  ;;  %s455_s14 = sphi %s483_s14, %s13_s14   ;;  %s451_s13 = sphi %s481_s13, %s523_s13   ;;  %s447_s12 = sphi %s479_s12, %s522_s12  }
   0x3   : > { %p27_p1 = scmp.ge.s32.totalorder %s25_s15, 2  ;;  %p158_p2 = scmp.lt.s32.totalorder %s455_s14, 3 }
   0x5   : > { %s525_s15 = smov (%p27_p1, %s25_s15), 0  ;;  %p159_p3 = pnand %p393_p0, %p158_p2 }
   0x6   : > { %p191_p4 = scmp.lt.s32.totalorder (!%p159_p3), %s447_s12, 1  ;;  %v457_v0 = vmov (!%p159_p3), 0.0   ;;  %v458_v1 = vmov (!%p159_p3), 0   ;;  %v211_v2 = vld [vmem:[%s520_s2] sm:$0xff] (!%p159_p3)  ;;  %vm224_vm0 = vcmask (!%p159_p3), 1043456   ;;  %vm220_vm1 = vcmask (!%p159_p3), 31744  }
   0x7   : > { %162 = sbr.rel (%p159_p3) target bundleno = 238 (0xee), region = 32  ;;  %293 = vmatprep.mubr.f32.mxu0 (!%p159_p3), %v457_v0  ;;  %431 = vset.pattern.permute.xlu0 (!%p159_p3), %v458_v1  ;;  %v210_v5 = vld [vmem:[%s519_s1] sm:$0xff] (!%p159_p3) }
   0x8   : > { %215 = vperm.xlu0 (!%p159_p3), %431, %v211_v2  }
   0xe   : > { %s527_s12 = smov (!%p191_p4, %s447_s12), 1 }
   0xf   : > { %s403_s18 = sshll.u32 %s527_s12, 3  ;;  %s404_s24 = sshll.u32 %s527_s12, 4 }
  0x10   : > { %s198_s21 = scalar_lea.vmem %s518_s0, %s403_s18  ;;  %s208_s27 = scalar_lea.vmem %s521_s3, %s404_s24 }
  0x11   : > { %v212_v3 = vld [vmem:[%s198_s21] sm:$0xff] }
  0x12   : > { %v219_v4 = vcombine.high %v212_v3, %v212_v3 }
  0x14   : > { %398 = vmatprep.subr.msk.mxu0 %vm224_vm0, %v219_v4 }
  0x15   : > { %399 = vmatpush1.msk.msra.mxu0 %vm224_vm0, %v212_v3 }
  0x16   : > { %400 = vmatmul.mubr.msk.f32.vlgmr.msra.gmra.mrb[0].mxu0 %vm220_vm1, %v210_v5 }
  0x87   : > { %v216_v6 = vpop.permute.xlu0 %215 }
  0xe9   : > { %v295_v7 = vpop.f32.mrb[0].mxu0 }
  0xea   : > { %v296_v8 = vadd.f32 %v295_v7, %v216_v6  ;;  %v297_v9 = vpop.f32.mrb[1].mxu0 }
  0xeb   : > { %v298_v10 = vadd.f32 %v297_v9, %v216_v6 }
  0xec   : > { %300 = vst [vmem:[%s208_s27] sm:$0xff] %v296_v8 }
  0xed   : > { %301 = vst [vmem:[%s208_s27 + $0x8] sm:$0xff] %v298_v10 }
  0xee PF: > { %s13_s14 = sadd.s32 1, %s455_s14   ;;  %s522_s12 = smov %s451_s13 }
  0xef   : > { %p10_p5 = scmp.ge.s32.totalorder %s13_s14, 4   ;;  %s523_s13 = smov %s525_s15 }
  0xf1   :  { %12 = sbr.rel (!%p10_p5) target bundleno = 2 (0x2), region = 62 }

</bundles_post_ra>
